<compile_context>
chip_gen: v5e
topology: v5e:2x2
jax: 0.10.0
libtpu: 0.0.40
codegen_flags: <defaults>
</compile_context>

<pallas_src>
import functools
import math

import jax
import jax.numpy as jnp
from jax.experimental import pallas as pl
from jax.experimental.pallas import tpu as pltpu


# --------------------------------------------------------------------------
# Generation-aware VMEM budget and default tile sizes
# --------------------------------------------------------------------------
def _tpu_vmem_capacity():
    try:
        info = pltpu.get_tpu_info()
        cap = getattr(info, "vmem_capacity_bytes", None)
        if cap:
            return int(cap)
    except Exception:
        pass
    return 64 * 1024 * 1024          # conservative fallback (v7x-sized)


_VMEM_CAP = _tpu_vmem_capacity()
_BIG_VMEM = _VMEM_CAP >= 96 * 1024 * 1024          # v5e / v6e (128 MiB physical)
_VMEM_LIMIT = min(int(_VMEM_CAP * 0.8), 112 * 1024 * 1024)

_MM_TM = 1024 if _BIG_VMEM else 512
_MM_TN = 1024 if _BIG_VMEM else 512
_MM_TK = 512
_MOE_TT = 512 if _BIG_VMEM else 256
_MOE_TF = 512
_ATT_TQ_CANDS = (512, 256) if _BIG_VMEM else (256,)
_LN_FUSE_MAX_D = 2048 if _BIG_VMEM else 1024


def _round_up(x, m):
    return ((x + m - 1) // m) * m


def _tile(dim, pref):
    """Returns (tile, padded_dim). Full-extent block if dim <= pref, else pref + padding."""
    if dim <= pref:
        return dim, dim
    return pref, _round_up(dim, pref)


def _pad_axis(x, axis, target):
    pad = target - x.shape[axis]
    if pad == 0:
        return x
    widths = [(0, 0)] * x.ndim
    widths[axis] = (0, pad)
    return jnp.pad(x, widths)


# --------------------------------------------------------------------------
# Tiled matmul kernels (bf16 MXU feeds, f32 accumulation)
# --------------------------------------------------------------------------
def _matmul_kernel(a_ref, b_ref, o_ref, acc_ref):
    @pl.when(pl.program_id(2) == 0)
    def _():
        acc_ref[...] = jnp.zeros_like(acc_ref)

    acc_ref[...] += jnp.dot(a_ref[...], b_ref[...],
                            preferred_element_type=jnp.float32)

    @pl.when(pl.program_id(2) == pl.num_programs(2) - 1)
    def _():
        o_ref[...] = acc_ref[...].astype(o_ref.dtype)


def _matmul_nk1_kernel(a_ref, b_ref, o_ref):
    # Single-K-step specialization: no f32 accumulator round trip through VMEM.
    o_ref[...] = jnp.dot(a_ref[...], b_ref[...],
                         preferred_element_type=jnp.float32).astype(o_ref.dtype)


def matmul(a, b, *, out_dtype=jnp.bfloat16, tm=None, tn=None, tk=None):
    a = a.astype(jnp.bfloat16)
    b = b.astype(jnp.bfloat16)
    M, K = a.shape
    K2, N = b.shape
    assert K == K2
    tm = tm or _MM_TM
    tn = tn or _MM_TN
    tk = tk or _MM_TK
    tm, Mp = _tile(M, tm)
    tn, Np = _tile(N, tn)
    tk, Kp = _tile(K, tk)
    a = _pad_axis(_pad_axis(a, 0, Mp), 1, Kp)
    b = _pad_axis(_pad_axis(b, 0, Kp), 1, Np)
    nk = Kp // tk
    if nk == 1:
        out = pl.pallas_call(
            _matmul_nk1_kernel,
            out_shape=jax.ShapeDtypeStruct((Mp, Np), out_dtype),
            grid_spec=pltpu.PrefetchScalarGridSpec(
                num_scalar_prefetch=0,
                grid=(Mp // tm, Np // tn),
                in_specs=[pl.BlockSpec((tm, Kp), lambda i, j: (i, 0)),
                          pl.BlockSpec((Kp, tn), lambda i, j: (0, j))],
                out_specs=pl.BlockSpec((tm, tn), lambda i, j: (i, j))),
            compiler_params=pltpu.CompilerParams(
                dimension_semantics=("parallel", "parallel"),
                vmem_limit_bytes=_VMEM_LIMIT),
        )(a, b)
    else:
        out = pl.pallas_call(
            _matmul_kernel,
            out_shape=jax.ShapeDtypeStruct((Mp, Np), out_dtype),
            grid_spec=pltpu.PrefetchScalarGridSpec(
                num_scalar_prefetch=0,
                grid=(Mp // tm, Np // tn, nk),
                in_specs=[pl.BlockSpec((tm, tk), lambda i, j, k: (i, k)),
                          pl.BlockSpec((tk, tn), lambda i, j, k: (k, j))],
                out_specs=pl.BlockSpec((tm, tn), lambda i, j, k: (i, j)),
                scratch_shapes=[pltpu.VMEM((tm, tn), jnp.float32)]),
            compiler_params=pltpu.CompilerParams(
                dimension_semantics=("parallel", "parallel", "arbitrary"),
                vmem_limit_bytes=_VMEM_LIMIT),
        )(a, b)
    if (Mp, Np) != (M, N):
        out = out[:M, :N]
    return out


# --------------------------------------------------------------------------
# LayerNorm (standalone fallback) and fused LayerNorm+matmul
# --------------------------------------------------------------------------
def _layernorm_kernel(x_ref, g_ref, b_ref, o_ref):
    x = x_ref[...].astype(jnp.float32)
    mean = jnp.mean(x, axis=-1, keepdims=True)
    xc = x - mean
    var = jnp.mean(xc * xc, axis=-1, keepdims=True)
    inv = jax.lax.rsqrt(var + 1e-5)
    o_ref[...] = ((xc * inv) * g_ref[...] + b_ref[...]).astype(o_ref.dtype)


def layernorm(x, gamma, beta, *, tt=512):
    T, D = x.shape
    tt, Tp = _tile(T, tt)
    xp = _pad_axis(x, 0, Tp)
    out = pl.pallas_call(
        _layernorm_kernel,
        out_shape=jax.ShapeDtypeStruct((Tp, D), jnp.bfloat16),
        grid_spec=pltpu.PrefetchScalarGridSpec(
            num_scalar_prefetch=0,
            grid=(Tp // tt,),
            in_specs=[pl.BlockSpec((tt, D), lambda i: (i, 0)),
                      pl.BlockSpec((1, D), lambda i: (0, 0)),
                      pl.BlockSpec((1, D), lambda i: (0, 0))],
            out_specs=pl.BlockSpec((tt, D), lambda i: (i, 0))),
        compiler_params=pltpu.CompilerParams(
            dimension_semantics=("parallel",),
            vmem_limit_bytes=_VMEM_LIMIT),
    )(xp, gamma.reshape(1, D).astype(jnp.float32), beta.reshape(1, D).astype(jnp.float32))
    return out[:T] if Tp != T else out


def _ln_matmul_kernel(x_ref, g_ref, b_ref, w_ref, o_ref):
    # LayerNorm computed on the resident A-tile (full-D block), result fed straight to MXU.
    x = x_ref[...].astype(jnp.float32)
    mean = jnp.mean(x, axis=-1, keepdims=True)
    xc = x - mean
    var = jnp.mean(xc * xc, axis=-1, keepdims=True)
    inv = jax.lax.rsqrt(var + 1e-5)
    xn = ((xc * inv) * g_ref[...] + b_ref[...]).astype(jnp.bfloat16)
    o_ref[...] = jnp.dot(xn, w_ref[...],
                         preferred_element_type=jnp.float32).astype(o_ref.dtype)


def ln_matmul(x, gamma, beta, w, *, out_dtype=jnp.bfloat16, tm=None, tn=None):
    """Fused LayerNorm(x) @ w when D fits a single K block; otherwise LN + tiled matmul."""
    T, D = x.shape
    D2, N = w.shape
    assert D == D2
    if D > _LN_FUSE_MAX_D:
        return matmul(layernorm(x, gamma, beta), w, out_dtype=out_dtype)
    tm = tm or _MM_TM
    tn = tn or _MM_TN
    tm, Tp = _tile(T, tm)
    tn, Np = _tile(N, tn)
    xp = _pad_axis(x.astype(jnp.float32), 0, Tp)
    wp = _pad_axis(w.astype(jnp.bfloat16), 1, Np)
    out = pl.pallas_call(
        _ln_matmul_kernel,
        out_shape=jax.ShapeDtypeStruct((Tp, Np), out_dtype),
        grid_spec=pltpu.PrefetchScalarGridSpec(
            num_scalar_prefetch=0,
            grid=(Tp // tm, Np // tn),
            in_specs=[pl.BlockSpec((tm, D), lambda i, j: (i, 0)),
                      pl.BlockSpec((1, D), lambda i, j: (0, 0)),
                      pl.BlockSpec((1, D), lambda i, j: (0, 0)),
                      pl.BlockSpec((D, tn), lambda i, j: (0, j))],
            out_specs=pl.BlockSpec((tm, tn), lambda i, j: (i, j))),
        compiler_params=pltpu.CompilerParams(
            dimension_semantics=("parallel", "parallel"),
            vmem_limit_bytes=_VMEM_LIMIT),
    )(xp, gamma.reshape(1, D).astype(jnp.float32),
      beta.reshape(1, D).astype(jnp.float32), wp)
    if (Tp, Np) != (T, N):
        out = out[:T, :N]
    return out


# --------------------------------------------------------------------------
# Flash-style attention: heads blocked per grid step, K/V streamed on an
# "arbitrary" axis with online softmax. q tile decoupled from kv tile; scaled
# q hoisted into a scratch; ragged S padded + key-masked. Non-causal (see TODO).
# --------------------------------------------------------------------------
def _flash_attn_kernel(q_ref, k_ref, v_ref, o_ref, qs_ref, m_sc, l_sc, acc_sc,
                       *, scale, tkv, s_valid, need_mask):
    ki = pl.program_id(2)

    @pl.when(ki == 0)
    def _():
        # fold 1/sqrt(Dh) into q once per (head-block, q-tile), not per kv step
        qs_ref[...] = (q_ref[...].astype(jnp.float32) * scale).astype(jnp.bfloat16)
        m_sc[...] = jnp.full_like(m_sc, -jnp.inf)
        l_sc[...] = jnp.zeros_like(l_sc)
        acc_sc[...] = jnp.zeros_like(acc_sc)

    s = jnp.einsum('hqd,hkd->hqk', qs_ref[...], k_ref[...],
                   preferred_element_type=jnp.float32)
    if need_mask:
        col = ki * tkv + jax.lax.broadcasted_iota(jnp.int32, s.shape, 2)
        valid = col < s_valid
        s = jnp.where(valid, s, -1e30)

    m_prev = m_sc[...]
    m_new = jnp.maximum(m_prev, jnp.max(s, axis=-1, keepdims=True))
    alpha = jnp.exp(m_prev - m_new)
    p = jnp.exp(s - m_new)
    if need_mask:
        p = jnp.where(valid, p, 0.0)
    l_sc[...] = alpha * l_sc[...] + jnp.sum(p, axis=-1, keepdims=True)
    acc_sc[...] = alpha * acc_sc[...] + jnp.einsum(
        'hqk,hkd->hqd', p.astype(jnp.bfloat16), v_ref[...],
        preferred_element_type=jnp.float32)
    m_sc[...] = m_new

    @pl.when(ki == pl.num_programs(2) - 1)
    def _():
        # exact normalization (epilogue-only divide; approx reciprocal flagged by review)
        o_ref[...] = (acc_sc[...] / l_sc[...]).astype(o_ref.dtype)


def attention(q, k, v):
    BH, S, Dh = q.shape
    scale = 1.0 / math.sqrt(Dh)
    hb = 1
    for cand in (8, 4, 2, 1):
        if BH % cand == 0:
            hb = cand
            break
    if S <= 128:
        tq = tkv = S
        Sp = S
    else:
        tkv = 128
        Sp = _round_up(S, 128)
        tq = 128
        for cand in _ATT_TQ_CANDS:
            if Sp % cand == 0:
                tq = cand
                break
    need_mask = Sp != S
    q = _pad_axis(q.astype(jnp.bfloat16), 1, Sp)
    k = _pad_axis(k.astype(jnp.bfloat16), 1, Sp)
    v = _pad_axis(v.astype(jnp.bfloat16), 1, Sp)
    q_spec = pl.BlockSpec((hb, tq, Dh), lambda h, qi, ki: (h, qi, 0))
    kv_spec = pl.BlockSpec((hb, tkv, Dh), lambda h, qi, ki: (h, ki, 0))
    out = pl.pallas_call(
        functools.partial(_flash_attn_kernel, scale=scale, tkv=tkv,
                          s_valid=S, need_mask=need_mask),
        out_shape=jax.ShapeDtypeStruct((BH, Sp, Dh), jnp.bfloat16),
        grid_spec=pltpu.PrefetchScalarGridSpec(
            num_scalar_prefetch=0,
            grid=(BH // hb, Sp // tq, Sp // tkv),
            in_specs=[q_spec, kv_spec, kv_spec],
            out_specs=q_spec,
            scratch_shapes=[pltpu.VMEM((hb, tq, Dh), jnp.bfloat16),   # scaled q
                            pltpu.VMEM((hb, tq, 1), jnp.float32),     # running max
                            pltpu.VMEM((hb, tq, 1), jnp.float32),     # running denom
                            pltpu.VMEM((hb, tq, Dh), jnp.float32)]),  # output acc
        compiler_params=pltpu.CompilerParams(
            dimension_semantics=("parallel", "parallel", "arbitrary"),
            vmem_limit_bytes=_VMEM_LIMIT),
    )(q, k, v)
    return out[:, :S] if need_mask else out


# --------------------------------------------------------------------------
# MoE SwiGLU experts with fused input LayerNorm. Grid = (token_tile, expert, d_ff tile).
# Per-(tile, expert) activity flags + "last active expert" fetch indices are
# scalar-prefetched to SMEM: inactive steps skip all compute via pl.when AND repeat the
# previous weight block index in the index_maps so Pallas skips the weight HBM DMA.
# --------------------------------------------------------------------------
def _moe_kernel(flags_ref, fetch_ref, x_ref, g1_ref, b1_ref, w1_ref, w3_ref, w2_ref,
                gate_ref, o_ref, xn_ref, gcol_ref, acc_ref):
    i = pl.program_id(0)
    e = pl.program_id(1)
    f = pl.program_id(2)

    @pl.when(jnp.logical_and(e == 0, f == 0))
    def _():
        # fused LayerNorm of the resident token tile, computed once per tile
        x = x_ref[...].astype(jnp.float32)
        mean = jnp.mean(x, axis=-1, keepdims=True)
        xc = x - mean
        var = jnp.mean(xc * xc, axis=-1, keepdims=True)
        inv = jax.lax.rsqrt(var + 1e-5)
        xn_ref[...] = ((xc * inv) * g1_ref[...] + b1_ref[...]).astype(jnp.bfloat16)
        acc_ref[...] = jnp.zeros_like(acc_ref)

    @pl.when(flags_ref[i, e] != 0)
    def _():
        @pl.when(f == 0)
        def _():
            # hoist per-expert gate column extraction out of the d_ff loop
            col = jax.lax.broadcasted_iota(jnp.int32, gate_ref.shape, 1)
            gcol_ref[...] = jnp.sum(jnp.where(col == e, gate_ref[...], 0.0),
                                    axis=1, keepdims=True)
        x = xn_ref[...]                                      # (tt, D) bf16
        h_gate = jnp.dot(x, w1_ref[0], preferred_element_type=jnp.float32)
        h_up = jnp.dot(x, w3_ref[0], preferred_element_type=jnp.float32)
        act = (h_gate * jax.nn.sigmoid(h_gate)) * h_up       # SwiGLU in f32
        y = jnp.dot(act.astype(jnp.bfloat16), w2_ref[0],
                    preferred_element_type=jnp.float32)      # (tt, D)
        acc_ref[...] += gcol_ref[...] * y

    @pl.when(jnp.logical_and(e == pl.num_programs(1) - 1,
                             f == pl.num_programs(2) - 1))
    def _():
        o_ref[...] = acc_ref[...].astype(o_ref.dtype)


def moe_experts(x, ln_g, ln_b, w1, w3, w2, gates, *, tt=None, tf=None):
    T, D = x.shape
    E, _, F = w1.shape
    tt = tt or _MOE_TT
    tf = tf or _MOE_TF
    tt, Tp = _tile(T, tt)
    tf, Fp = _tile(F, tf)
    if Fp != F:
        w1 = _pad_axis(w1, 2, Fp)
        w3 = _pad_axis(w3, 2, Fp)
        w2 = _pad_axis(w2, 1, Fp)
    xp = _pad_axis(x.astype(jnp.float32), 0, Tp)
    gp = _pad_axis(gates.astype(jnp.float32), 0, Tp)
    nt = Tp // tt
    nf = Fp // tf

    # activity flags: relies on combined gate weights being exactly 0 for unselected experts
    flags = (jnp.max(gp.reshape(nt, tt, E), axis=1) > 0).astype(jnp.int32)      # (nt, E)

    # "last active expert at-or-before this grid step" (flattened (tile, expert) order);
    # inactive steps return this index (and the last d_ff block) so the weight block index
    # does not change -> Pallas skips the weight DMA for inactive (tile, expert) pairs.
    flat = flags.reshape(-1)
    eidx = jnp.tile(jnp.arange(E, dtype=jnp.int32), nt)

    def _carry(prev, pair):
        fl, ee = pair
        cur = jnp.where(fl > 0, ee, prev)
        return cur, cur

    _, fetch_flat = jax.lax.scan(_carry, jnp.int32(0), (flat, eidx))
    fetch_e = fetch_flat.reshape(nt, E)

    nf_last = nf - 1

    def w1_map(i, e, f, fl, fe):
        ff = jnp.where(fl[i, e] != 0, f, nf_last)
        return (fe[i, e], 0, ff)

    def w3_map(i, e, f, fl, fe):
        ff = jnp.where(fl[i, e] != 0, f, nf_last)
        return (fe[i, e], 0, ff)

    def w2_map(i, e, f, fl, fe):
        ff = jnp.where(fl[i, e] != 0, f, nf_last)
        return (fe[i, e], ff, 0)

    out = pl.pallas_call(
        _moe_kernel,
        out_shape=jax.ShapeDtypeStruct((Tp, D), jnp.float32),
        grid_spec=pltpu.PrefetchScalarGridSpec(
            num_scalar_prefetch=2,
            grid=(nt, E, nf),
            in_specs=[pl.BlockSpec((tt, D), lambda i, e, f, fl, fe: (i, 0)),
                      pl.BlockSpec((1, D), lambda i, e, f, fl, fe: (0, 0)),
                      pl.BlockSpec((1, D), lambda i, e, f, fl, fe: (0, 0)),
                      pl.BlockSpec((1, D, tf), w1_map),
                      pl.BlockSpec((1, D, tf), w3_map),
                      pl.BlockSpec((1, tf, D), w2_map),
                      pl.BlockSpec((tt, E), lambda i, e, f, fl, fe: (i, 0))],
            out_specs=pl.BlockSpec((tt, D), lambda i, e, f, fl, fe: (i, 0)),
            scratch_shapes=[pltpu.VMEM((tt, D), jnp.bfloat16),    # normalized x
                            pltpu.VMEM((tt, 1), jnp.float32),     # per-expert gate column
                            pltpu.VMEM((tt, D), jnp.float32)]),   # output accumulator
        compiler_params=pltpu.CompilerParams(
            dimension_semantics=("parallel", "arbitrary", "arbitrary"),
            vmem_limit_bytes=_VMEM_LIMIT),
    )(flags, fetch_e, xp,
      ln_g.reshape(1, D).astype(jnp.float32), ln_b.reshape(1, D).astype(jnp.float32),
      w1.astype(jnp.bfloat16), w3.astype(jnp.bfloat16), w2.astype(jnp.bfloat16), gp)
    return out[:T] if Tp != T else out


# --------------------------------------------------------------------------
# Model wrapper (glue in plain JAX)
# --------------------------------------------------------------------------
def topk_gates(logits, k):
    probs = jax.nn.softmax(logits.astype(jnp.float32), axis=-1)
    topv, topi = jax.lax.top_k(probs, k)
    topv = topv / jnp.sum(topv, axis=-1, keepdims=True)
    E = logits.shape[-1]
    onehots = jax.nn.one_hot(topi, E, dtype=probs.dtype)     # (T, k, E)
    return jnp.sum(onehots * topv[..., None], axis=1)        # dense (T, E) gates


def init_params(key, cfg):
    D, V, S_max = cfg["d_model"], cfg["vocab_size"], cfg["seq_length"]
    E, F = cfg["num_experts"], cfg["d_ff"]

    def dense(k, shape, scale=0.02, dtype=jnp.bfloat16):
        return (scale * jax.random.normal(k, shape)).astype(dtype)

    keys = jax.random.split(key, 2 + cfg["num_layers"] + 1)
    params = {
        "tok_emb": dense(keys[0], (V, D), dtype=jnp.float32),
        "pos_emb": dense(keys[1], (S_max, D), dtype=jnp.float32),
        "layers": [],
    }
    for li in range(cfg["num_layers"]):
        lk = jax.random.split(keys[2 + li], 6)
        params["layers"].append({
            "ln1_g": jnp.ones((D,), jnp.float32), "ln1_b": jnp.zeros((D,), jnp.float32),
            "ln2_g": jnp.ones((D,), jnp.float32), "ln2_b": jnp.zeros((D,), jnp.float32),
            "wqkv": dense(lk[0], (D, 3 * D)),                 # fused Q|K|V projection
            "wo": dense(lk[1], (D, D)),
            "wg": dense(lk[2], (D, E)),                       # router gate (use_bias=False)
            "w1": dense(lk[3], (E, D, F)),                    # SwiGLU gate proj
            "w3": dense(lk[4], (E, D, F)),                    # SwiGLU up proj
            "w2": dense(lk[5], (E, F, D)),                    # SwiGLU down proj
        })
    ok = jax.random.split(keys[-1], 1)[0]
    params["wout"] = dense(ok, (D, V))
    params["bout"] = jnp.zeros((V,), jnp.float32)
    return params


def moe_transformer_forward(params, input_ids, cfg):
    B, S = input_ids.shape
    D, H = cfg["d_model"], cfg["num_heads"]
    Dh = D // H
    T = B * S

    tok = params["tok_emb"][input_ids]                          # (B,S,D) gather (glue)
    pos = params["pos_emb"][jnp.arange(S)][None, :, :]          # (1,S,D)
    h = (tok + pos).astype(jnp.float32)                         # residual stream in f32

    def split_heads(t):                                         # (T,D) -> (B*H,S,Dh)
        return t.reshape(B, S, H, Dh).transpose(0, 2, 1, 3).reshape(B * H, S, Dh)

    def merge_heads(t):                                         # (B*H,S,Dh) -> (T,D)
        return t.reshape(B, H, S, Dh).transpose(0, 2, 1, 3).reshape(T, D)

    for layer in params["layers"]:
        x2 = h.reshape(T, D)

        # --- self-attention sub-block (pre-LN fused into QKV matmul, residual) ---
        qkv = ln_matmul(x2, layer["ln1_g"], layer["ln1_b"], layer["wqkv"],
                        out_dtype=jnp.bfloat16)
        q, k, v = qkv[:, :D], qkv[:, D:2 * D], qkv[:, 2 * D:]
        ao = attention(split_heads(q), split_heads(k), split_heads(v))    # bf16
        x2 = x2 + matmul(merge_heads(ao), layer["wo"], out_dtype=jnp.float32)

        # --- MoE sub-block (pre-LN fused into router matmul and expert kernel) ---
        gate_logits = ln_matmul(x2, layer["ln2_g"], layer["ln2_b"], layer["wg"],
                                out_dtype=jnp.float32)                    # (T, E)
        gates = topk_gates(gate_logits, cfg["top_k"])                     # dense combine wts
        x2 = x2 + moe_experts(x2, layer["ln2_g"], layer["ln2_b"],
                              layer["w1"], layer["w3"], layer["w2"], gates)

        h = x2.reshape(B, S, D)

    logits = matmul(h.reshape(T, D), params["wout"], out_dtype=jnp.float32)
    logits = logits + params["bout"][None, :]
    return {"logits": logits.reshape(B, S, -1), "hidden_states": h}


if __name__ == "__main__":
    cfg = dict(d_model=32, num_layers=2, num_experts=4, top_k=2,
               num_heads=4, vocab_size=64, seq_length=8, d_ff=64)

    key = jax.random.PRNGKey(0)
    pkey, dkey = jax.random.split(key)
    params = init_params(pkey, cfg)

    batch, seq = 2, cfg["seq_length"]
    input_ids = jax.random.randint(dkey, (batch, seq), 0, cfg["vocab_size"], dtype=jnp.int32)

    out = moe_transformer_forward(params, input_ids, cfg)
    jax.block_until_ready(out["logits"])
    jax.block_until_ready(out["hidden_states"])

    assert out["logits"].shape == (batch, seq, cfg["vocab_size"])
    assert out["hidden_states"].shape == (batch, seq, cfg["d_model"])
    print("KERNEL_OK")
</pallas_src>

<mosaic_0001>
module attributes {stable_mosaic.version = 11 : i64} {
  func.func @_ln_matmul_kernel(%arg0: i32, %arg1: i32, %arg2: memref<16x32xf32, #tpu.memory_space<vmem>>, %arg3: memref<1x32xf32, #tpu.memory_space<vmem>>, %arg4: memref<1x32xf32, #tpu.memory_space<vmem>>, %arg5: memref<32x96xbf16, #tpu.memory_space<vmem>>, %arg6: memref<16x96xbf16, #tpu.memory_space<vmem>>) attributes {dimension_semantics = [#tpu.dimension_semantics<parallel>, #tpu.dimension_semantics<parallel>], iteration_bounds = array<i64: 1, 1>, scalar_prefetch = 0 : i64, scratch_operands = 0 : i64, tpu.core_type = #tpu.core_type<tc>, window_params = [{transform_indices = @transform_0, window_bounds = array<i64: 16, 32>}, {pipeline_mode = #tpu.pipeline_mode<synchronous>, transform_indices = @transform_1, window_bounds = array<i64: 1, 32>}, {pipeline_mode = #tpu.pipeline_mode<synchronous>, transform_indices = @transform_2, window_bounds = array<i64: 1, 32>}, {transform_indices = @transform_3, window_bounds = array<i64: 32, 96>}, {transform_indices = @transform_4, window_bounds = array<i64: 16, 96>}]} {
    %c0 = arith.constant 0 : index
    %c0_0 = arith.constant 0 : index
    %0 = vector.load %arg2[%c0, %c0_0] : memref<16x32xf32, #tpu.memory_space<vmem>>, vector<16x32xf32>
    %cst = arith.constant dense<0.000000e+00> : vector<16xf32>
    %1 = vector.multi_reduction <add>, %0, %cst [1] : vector<16x32xf32> to vector<16xf32>
    %2 = vector.shape_cast %1 : vector<16xf32> to vector<16x1xf32>
    %cst_1 = arith.constant 3.200000e+01 : f32
    %3 = vector.broadcast %cst_1 : f32 to vector<16x1xf32>
    %4 = arith.divf %2, %3 : vector<16x1xf32>
    %5 = vector.broadcast %4 : vector<16x1xf32> to vector<16x32xf32>
    %6 = arith.subf %0, %5 : vector<16x32xf32>
    %7 = arith.mulf %6, %6 : vector<16x32xf32>
    %cst_2 = arith.constant dense<0.000000e+00> : vector<16xf32>
    %8 = vector.multi_reduction <add>, %7, %cst_2 [1] : vector<16x32xf32> to vector<16xf32>
    %9 = vector.shape_cast %8 : vector<16xf32> to vector<16x1xf32>
    %cst_3 = arith.constant 3.200000e+01 : f32
    %10 = vector.broadcast %cst_3 : f32 to vector<16x1xf32>
    %11 = arith.divf %9, %10 : vector<16x1xf32>
    %cst_4 = arith.constant 9.99999974E-6 : f32
    %12 = vector.broadcast %cst_4 : f32 to vector<16x1xf32>
    %13 = arith.addf %11, %12 : vector<16x1xf32>
    %14 = math.rsqrt %13 : vector<16x1xf32>
    %15 = vector.broadcast %14 : vector<16x1xf32> to vector<16x32xf32>
    %16 = arith.mulf %6, %15 : vector<16x32xf32>
    %c0_5 = arith.constant 0 : index
    %c0_6 = arith.constant 0 : index
    %17 = vector.load %arg3[%c0_5, %c0_6] : memref<1x32xf32, #tpu.memory_space<vmem>>, vector<1x32xf32>
    %18 = vector.broadcast %17 : vector<1x32xf32> to vector<16x32xf32>
    %19 = arith.mulf %16, %18 : vector<16x32xf32>
    %c0_7 = arith.constant 0 : index
    %c0_8 = arith.constant 0 : index
    %20 = vector.load %arg4[%c0_7, %c0_8] : memref<1x32xf32, #tpu.memory_space<vmem>>, vector<1x32xf32>
    %21 = vector.broadcast %20 : vector<1x32xf32> to vector<16x32xf32>
    %22 = arith.addf %19, %21 : vector<16x32xf32>
    %23 = arith.truncf %22 : vector<16x32xf32> to vector<16x32xbf16>
    %c0_9 = arith.constant 0 : index
    %c0_10 = arith.constant 0 : index
    %24 = vector.load %arg5[%c0_9, %c0_10] : memref<32x96xbf16, #tpu.memory_space<vmem>>, vector<32x96xbf16>
    %cst_11 = arith.constant dense<0.000000e+00> : vector<16x96xf32>
    %25 = tpu.matmul %23, %24, %cst_11 {dimension_numbers = #tpu.dot_dimension_numbers<[1], [0], [0], [1], [0, 0, 1, 1], [], []>} : vector<16x32xbf16>, vector<32x96xbf16>, vector<16x96xf32> -> vector<16x96xf32>
    %26 = arith.truncf %25 : vector<16x96xf32> to vector<16x96xbf16>
    %c0_12 = arith.constant 0 : index
    %c0_13 = arith.constant 0 : index
    %27 = vector.load %arg6[%c0_12, %c0_13] : memref<16x96xbf16, #tpu.memory_space<vmem>>, vector<16x96xbf16>
    tpu.vector_store %arg6[%c0_12, %c0_13], %26 {strides = array<i32>} : memref<16x96xbf16, #tpu.memory_space<vmem>>, vector<16x96xbf16>,
    return
  }
  func.func @transform_0(%arg0: i32, %arg1: i32) -> (i32, i32) {
    %c0_i32 = arith.constant 0 : i32
    %c0_i32_0 = arith.constant 0 : i32
    return %arg0, %c0_i32 : i32, i32
  }
  func.func @transform_1(%arg0: i32, %arg1: i32) -> (i32, i32) {
    %c0_i32 = arith.constant 0 : i32
    %c0_i32_0 = arith.constant 0 : i32
    %c0_i32_1 = arith.constant 0 : i32
    return %c0_i32, %c0_i32_0 : i32, i32
  }
  func.func @transform_2(%arg0: i32, %arg1: i32) -> (i32, i32) {
    %c0_i32 = arith.constant 0 : i32
    %c0_i32_0 = arith.constant 0 : i32
    %c0_i32_1 = arith.constant 0 : i32
    return %c0_i32, %c0_i32_0 : i32, i32
  }
  func.func @transform_3(%arg0: i32, %arg1: i32) -> (i32, i32) {
    %c0_i32 = arith.constant 0 : i32
    %c0_i32_0 = arith.constant 0 : i32
    return %c0_i32, %arg1 : i32, i32
  }
  func.func @transform_4(%arg0: i32, %arg1: i32) -> (i32, i32) {
    %c0_i32 = arith.constant 0 : i32
    return %arg0, %arg1 : i32, i32
  }
}

</mosaic_0001>

<bundles_post_ra>
// kernel: tpu_custom_call.1
= control target key start
LH: loop header
LB: loop body
LE: loop exit
PB: predicated region body
PF: predicated region fallthrough
CT: control target
= control target key end

     0   :  { %9 = vsyncpa [#allocation3], 0  ;;  %s379_s0 = inlined_call_operand.hbm [shape: f32[16,32], index: 0, kind: input, shape index: {}]   ;;  %s380_s1 = inlined_call_operand.hbm [shape: f32[1,32], index: 1, kind: input, shape index: {}]   ;;  %s381_s2 = inlined_call_operand.vmem [shape: f32[1,32], index: 2, kind: input, shape index: {}]   ;;  %s382_s3 = inlined_call_operand.hbm [shape: bf16[32,96], index: 3, kind: input, shape index: {}]   ;;  %s383_s4 = inlined_call_operand.hbm [shape: bf16[16,96], index: 4, kind: output, shape index: {}]  }
   0x1   :  { %10 = vsyncpa [#allocation6], 0  ;;  %s30_s17 = sshll.u32 %s380_s1, 4  ;;  %s31_s17 = int_to_ptr.hbm [resolvable:$true] %s30_s17 }
   0x2   :  { %11 = vsyncpa [#allocation4], 0  ;;  %s319_s18 = smov [#allocation5]   ;;  %s16_s22 = sshll.u32 %s379_s0, 4  ;;  %s17_s22 = int_to_ptr.hbm [resolvable:$true] %s16_s22 }
   0x3   :  { %s32_s19 = sshll.u32 %s319_s18, 4  ;;  %s320_s23 = smov [#allocation2]   ;;  %s33_s19 = int_to_ptr.vmem [resolvable:$true] %s32_s19 }
   0x4   :  { %35 = dma.hbm_to_vmem [thread:$0]  %s31_s17, 16, %s33_s19, [#allocation6]  }
   0x5   :  { %s18_s24 = sshll.u32 %s320_s23, 4  ;;  %s321_s25 = smov 128   ;;  %s19_s24 = int_to_ptr.vmem [resolvable:$true] %s18_s24 }
   0x6   :  { %s322_s26 = smov 8   ;;  %s42_s1 = sshll.u32 %s382_s3, 4  ;;  %s43_s1 = int_to_ptr.hbm [resolvable:$true] %s42_s1 }
   0x7   :  { %24 = dma.hbm_to_vmem [thread:$0]  %s17_s22, 256, %s19_s24, [#allocation3], %s321_s25, %s321_s25, %s322_s26  }
   0x8   :  { %s323_s29 = smov [#allocation7]   ;;  %s324_s5 = smov 64  }
   0x9   :  { %s44_s30 = sshll.u32 %s323_s29, 4  ;;  %s325_s6 = smov 4   ;;  %s45_s30 = int_to_ptr.vmem [resolvable:$true] %s44_s30 }
   0xa   :  { %50 = dma.hbm_to_vmem [thread:$0]  %s43_s1, 256, %s45_s30, [#allocation6], %s324_s5, %s324_s5, %s325_s6  }
   0xb   :  { %313 = dma.done.wait [#allocation3], 256  }
   0xc   :  { %314 = vsyncadd [#allocation3], 4294967040 }
   0xd   :  { %315 = dma.done.wait [#allocation6], 272  }
   0xe   :  { %316 = vsyncadd [#allocation6], 4294967024  ;;  %vm66_vm0 = vcmask 261120   ;;  %v64_v0 = vld [vmem:[#allocation2] sm:$0xff]  ;;  %v65_v2 = vld [vmem:[#allocation2 + $0x8] sm:$0xff]  ;;  %v326_v4 = vmov 32.0  }
   0xf   :  { %v67_v1 = vsel %vm66_vm0, %v64_v0, 0.0  ;;  %v70_v3 = vsel %vm66_vm0, %v65_v2, 0.0  ;;  %211 = vrcp.f32 %v326_v4  ;;  %v199_v21 = vld [vmem:[#allocation7 + $0x8] sm:$0xff]  ;;  %v198_v23 = vld [vmem:[#allocation7] sm:$0xff]  ;;  %v209_v42 = vld [vmem:[#allocation5] ss:$0 sm:$0xff] }
  0x10   :  { %68 = vadd.xlane.f32.xlu0 %v67_v1  ;;  %156 = vmatpush.bf16.msra.mxu0 %v199_v21  ;;  %v210_v47 = vld [vmem:[%s381_s2] ss:$0 sm:$0xff]  ;;  %vm166_vm8 = vcmask 781312   ;;  %s327_s7 = smov [#allocation8]   ;;  %s175_s11 = sshll.u32 %s383_s4, 4  ;;  %s176_s11 = int_to_ptr.hbm [resolvable:$true] %s175_s11 }
  0x11   :  { %s173_s8 = sshll.u32 %s327_s7, 4  ;;  %s174_s8 = int_to_ptr.vmem [resolvable:$true] %s173_s8 }
  0x14   :  { %157 = vmatpush.bf16.msra.mxu0 %v198_v23 }
  0x15   :  { %v212_v5 = vpop.eup %211 }
  0x16   :  { %v74_v6 = vmul.f32 32.0, %v212_v5  ;;  %vm78_vm1 = vweird.f32 %v212_v5 }
  0x18   :  { %71 = vadd.xlane.f32.xlu0 %v70_v3  ;;  %v75_v7 = vsub.f32 1.0, %v74_v6 }
  0x1a   :  { %v76_v8 = vmul.f32 %v212_v5, %v75_v7 }
  0x1c   :  { %v77_v9 = vadd.f32 %v212_v5, %v76_v8 }
  0x1e   :  { %v79_v10 = vsel %vm78_vm1, %v212_v5, %v77_v9 }
  0x83   :  { %v69_v11 = vpop.xlane.xlu0 %68 }
  0x84   :  { %v80_v12 = vmul.f32 %v79_v10, %v69_v11 }
  0x86   :  { %v82_v13 = vsub.f32 %v64_v0, %v80_v12 }
  0x88   :  { %v84_v14 = vmul.f32 %v82_v13, %v82_v13 }
  0x8a   :  { %v86_v15 = vsel %vm66_vm0, %v84_v14, 0.0 }
  0x8b   :  { %87 = vadd.xlane.f32.xlu1 %v86_v15  ;;  %v72_v16 = vpop.xlane.xlu0 %71 }
  0x8c   :  { %v81_v17 = vmul.f32 %v79_v10, %v72_v16 }
  0x8e   :  { %v83_v18 = vsub.f32 %v65_v2, %v81_v17 }
  0x90   :  { %v85_v19 = vmul.f32 %v83_v18, %v83_v18 }
  0x92   :  { %v89_v20 = vsel %vm66_vm0, %v85_v19, 0.0 }
  0x93   :  { %90 = vadd.xlane.f32.xlu1 %v89_v20 }
  0xfe   :  { %v88_v22 = vpop.xlane.xlu1 %87 }
  0xff   :  { %v92_v24 = vmul.f32 %v88_v22, %v79_v10 }
 0x101   :  { %v94_v25 = vadd.f32 1e-05, %v92_v24 }
 0x103   :  { %213 = vrsqrt.f32 %v94_v25  ;;  %vm102_vm3 = vweird.f32 %v94_v25 }
 0x106   :  { %v91_v26 = vpop.xlane.xlu1 %90 }
 0x107   :  { %v93_v27 = vmul.f32 %v91_v26, %v79_v10 }
 0x109   :  { %v214_v28 = vpop.eup %213  ;;  %v95_v29 = vadd.f32 1e-05, %v93_v27 }
 0x10a   :  { %v97_v30 = vmul.f32 %v214_v28, %v94_v25  ;;  %vm103_vm2 = vweird.f32 %v214_v28 }
 0x10b   :  { %215 = vrsqrt.f32 %v95_v29  ;;  %vm104_vm4 = vmor %vm102_vm3, %vm103_vm2  ;;  %vm112_vm6 = vweird.f32 %v95_v29 }
 0x10c   :  { %v98_v31 = vmul.f32 %v214_v28, %v97_v30 }
 0x10e   :  { %v99_v32 = vmul.f32 0.5, %v98_v31 }
 0x110   :  { %v100_v33 = vsub.f32 1.5, %v99_v32 }
 0x111   :  { %v216_v34 = vpop.eup %215 }
 0x112   :  { %v101_v35 = vmul.f32 %v214_v28, %v100_v33  ;;  %v107_v36 = vmul.f32 %v216_v34, %v95_v29  ;;  %vm113_vm5 = vweird.f32 %v216_v34 }
 0x113   :  { %vm114_vm7 = vmor %vm112_vm6, %vm113_vm5 }
 0x114   :  { %v108_v37 = vmul.f32 %v216_v34, %v107_v36  ;;  %v105_v38 = vsel %vm104_vm4, %v214_v28, %v101_v35 }
 0x115   :  { %v116_v41 = vmul.f32 %v105_v38, %v82_v13 }
 0x116   :  { %v109_v39 = vmul.f32 0.5, %v108_v37 }
 0x117   :  { %v122_v46 = vmul.f32 %v209_v42, %v116_v41 }
 0x118   :  { %v110_v40 = vsub.f32 1.5, %v109_v39 }
 0x119   :  { %v128_v49 = vadd.f32 %v210_v47, %v122_v46 }
 0x11a   :  { %v111_v43 = vmul.f32 %v216_v34, %v110_v40 }
 0x11c   :  { %v115_v44 = vsel %vm114_vm7, %v216_v34, %v111_v43 }
 0x11d   :  { %v117_v45 = vmul.f32 %v115_v44, %v83_v18 }
 0x11f   :  { %v123_v48 = vmul.f32 %v209_v42, %v117_v45 }
 0x121   :  { %v129_v50 = vadd.f32 %v210_v47, %v123_v48 }
 0x123   :  { %v130_v51 = vpack.c.bf16 %v129_v50, %v128_v49 }
 0x125   :  { %197 = vmatmul.msk.bf16.vlgmr.msra.gmra.mxu0 %vm66_vm0, %v130_v51 }
 0x1a2   :  { %v159_v52 = vpop.f32.mrf.mxu0 }
 0x1a3   :  { %v164_v53 = vpack.c.bf16 %v159_v52, %v159_v52 }
 0x1a5   :  { %167 = vst.msk [vmem:[#allocation8] sm:$0xf] %vm166_vm8, %v164_v53 }
 0x1aa   :  { %v161_v54 = vpop.f32.mrf.mxu0 }
 0x1ab   :  { %v165_v55 = vpack.c.bf16 %v161_v54, %v161_v54 }
 0x1ad   :  { %168 = vst.msk [vmem:[#allocation8 + $0x4] sm:$0xf] %vm166_vm8, %v165_v55 }
 0x1ae   :  { %181 = dma.vmem_to_hbm [thread:$0]  %s174_s8, 128, %s176_s11, [#allocation4], %s324_s5, %s324_s5, %s325_s6  }
 0x1af   :  { %317 = dma.done.wait [#allocation4], 128  }
 0x1b0   :  { %318 = vsyncadd [#allocation4], 4294967168 }
 0x1b1   :  { %186 = vsyncpa [#allocation3], 1 }
 0x1b2   :  { %187 = vsyncpa [#allocation6], 1 }
 0x1b3   :  { %188 = vsyncpa [#allocation4], 1 }

</bundles_post_ra>
